<compile_context>
chip_gen: v7x
topology: tpu7x:2x2x1
jax: 0.10.0
libtpu: 0.0.40
codegen_flags: <defaults>
</compile_context>

<pallas_src>
import functools

import jax
import jax.numpy as jnp
from jax.experimental import pallas as pl
from jax.experimental.pallas import tpu as pltpu


def _round_up(x, m):
    return ((x + m - 1) // m) * m


# ----------------------------------------------------------------------------
# Kernel 1: per-core partial sum of squared (last-value - target) over rows.
# ----------------------------------------------------------------------------
def _sigma_partial_kernel(last_ref, tgt_ref, out_ref, *, tile_rows, bpc, n_rows):
    # last_ref : (tN, 1)  -- last observed value of each training window
    # tgt_ref  : (tN, H)  -- training targets (native dtype)
    # out_ref  : (1, H) f32 -- per-core resident accumulator
    c = pl.program_id(0)
    i = pl.program_id(1)

    @pl.when(i == 0)
    def _():
        out_ref[...] = jnp.zeros_like(out_ref)

    # Mask rows past the true N (ragged tail / phantom blocks on the 2nd core).
    block_idx = c * bpc + i
    row0 = block_idx * tile_rows
    rows = row0 + jax.lax.broadcasted_iota(jnp.int32, (tile_rows, 1), 0)
    valid = rows < n_rows

    diff = last_ref[...].astype(jnp.float32) - tgt_ref[...].astype(jnp.float32)
    diff = jnp.where(valid, diff, 0.0)
    out_ref[...] += jnp.sum(diff * diff, axis=0, keepdims=True)


def calc_sigmas(train_inputs, train_target):
    """train_inputs: (N, L, 1), train_target: (N, H, 1) -> sigmas (H,) f32."""
    tgt = train_target[:, :, 0]            # (N, H), native dtype
    last = train_inputs[:, -1, :]          # (N, 1), native dtype
    N, H = tgt.shape

    # Row tile sized by bytes (~4 MiB per streamed target block), multiple of 8.
    bytes_per_row = max(int(H) * tgt.dtype.itemsize, 1)
    target_block_bytes = 4 * 1024 * 1024
    tN = max(8, min(_round_up(N, 8), (target_block_bytes // bytes_per_row) // 8 * 8))
    nblocks = pl.cdiv(N, tN)

    # Split the N-reduction across TensorCores (2 on v7x; serial elsewhere).
    ncores = 2 if nblocks >= 2 else 1
    bpc = pl.cdiv(nblocks, ncores)

    def blk_map(c, i):
        # Clamp phantom blocks (when nblocks is odd) onto a valid block; their
        # contribution is zeroed by the in-kernel row mask.
        return (jnp.minimum(c * bpc + i, nblocks - 1), 0)

    partials = pl.pallas_call(
        functools.partial(_sigma_partial_kernel, tile_rows=tN, bpc=bpc, n_rows=N),
        out_shape=jax.ShapeDtypeStruct((ncores, H), jnp.float32),
        grid=(ncores, bpc),
        in_specs=[
            pl.BlockSpec((tN, 1), blk_map),
            pl.BlockSpec((tN, H), blk_map),
        ],
        out_specs=pl.BlockSpec((1, H), lambda c, i: (c, 0)),
        compiler_params=pltpu.CompilerParams(
            dimension_semantics=("parallel", "arbitrary"),
            vmem_limit_bytes=32 * 1024 * 1024,
        ),
    )(last, tgt)

    # Tiny (ncores, H) epilogue: combine per-core partial sums, scale by 1/N, sqrt.
    return jnp.sqrt(jnp.sum(partials, axis=0) / jnp.float32(N))


# ----------------------------------------------------------------------------
# Kernel 2: forward pass — persist last value + repeat sigmas per batch row.
# ----------------------------------------------------------------------------
def _forward_kernel(xlast_ref, sig_ref, pred_ref, sigrep_ref):
    # xlast_ref : (tB, 1)  -- last observed value per batch row (native dtype)
    # sig_ref   : (1, H) f32
    # pred_ref  : (tB, H)  -- x.dtype
    # sigrep_ref: (tB, H)  -- f32
    tB, H = pred_ref.shape
    pred_ref[...] = jnp.broadcast_to(xlast_ref[...].astype(pred_ref.dtype), (tB, H))
    sigrep_ref[...] = jnp.broadcast_to(sig_ref[...].astype(sigrep_ref.dtype), (tB, H))


def t0_forward(x, sigmas):
    """x: (B, L, 1) -> (pred (B, H) in x.dtype, sigmas_rep (B, H) f32)."""
    B, L, _ = x.shape
    H = sigmas.shape[0]

    # Only the last timestep is needed: slice in the wrapper (negligible HBM).
    x_last = x[:, L - 1, :]                # (B, 1), native dtype
    sig2d = sigmas.astype(jnp.float32).reshape(1, H)

    # Batch tile sized by bytes (~4 MiB per streamed output block); with two
    # double-buffered outputs this keeps the working set ~16 MiB (< v7x cap).
    bytes_per_row = max(int(H) * x.dtype.itemsize, 1)
    target_block_bytes = 4 * 1024 * 1024
    tB = max(8, min(_round_up(B, 8), (target_block_bytes // bytes_per_row) // 8 * 8))

    pred, sigrep = pl.pallas_call(
        _forward_kernel,
        out_shape=(
            jax.ShapeDtypeStruct((B, H), x.dtype),
            jax.ShapeDtypeStruct((B, H), jnp.float32),
        ),
        grid=(pl.cdiv(B, tB),),
        in_specs=[
            pl.BlockSpec((tB, 1), lambda i: (i, 0)),
            pl.BlockSpec((1, H), lambda i: (0, 0)),
        ],
        out_specs=(
            pl.BlockSpec((tB, H), lambda i: (i, 0)),
            pl.BlockSpec((tB, H), lambda i: (i, 0)),
        ),
        compiler_params=pltpu.CompilerParams(
            dimension_semantics=("parallel",),           # megacore split on v7x
            vmem_limit_bytes=32 * 1024 * 1024,
        ),
    )(x_last, sig2d)
    return pred, sigrep


if __name__ == "__main__":
    key = jax.random.PRNGKey(0)
    k_tr_in, k_tr_tgt, k_x = jax.random.split(key, 3)

    # Small, deterministic synthetic "train_data" and forward input.
    # N not a multiple of 8 exercises the in-kernel ragged-row mask; B not a
    # multiple of 8 exercises dropped out-of-bounds output rows.
    N, L, H, B = 300, 12, 8, 10
    train_inputs = jax.random.normal(k_tr_in, (N, L, 1), dtype=jnp.float32)
    train_target = jax.random.normal(k_tr_tgt, (N, H, 1), dtype=jnp.float32)
    x = jax.random.normal(k_x, (B, L, 1), dtype=jnp.float32)

    # "Parameter" setup (the module's calc_sigmas), done with the Pallas kernel.
    sigmas = jax.block_until_ready(calc_sigmas(train_inputs, train_target))

    # Forward pass.
    pred, sig_rep = jax.block_until_ready(t0_forward(x, sigmas))

    # Pure-JAX reference of the exact PyTorch semantics.
    ref_sig = jnp.sqrt(
        jnp.sum(jnp.square(train_inputs[:, -1, :] - train_target[:, :, 0]), axis=0) / N
    )
    ref_pred = jnp.broadcast_to(x[:, -1, :], (B, H))
    ref_sig_rep = jnp.broadcast_to(ref_sig[None, :], (B, H))

    assert pred.shape == (B, H) and sig_rep.shape == (B, H)
    assert jnp.allclose(sigmas, ref_sig, atol=1e-5, rtol=1e-5)
    assert jnp.allclose(pred, ref_pred, atol=1e-5, rtol=1e-5)
    assert jnp.allclose(sig_rep, ref_sig_rep, atol=1e-5, rtol=1e-5)

    print("KERNEL_OK")
</pallas_src>

<mosaic_0001>
module attributes {stable_mosaic.version = 11 : i64} {
  func.func @_sigma_partial_kernel(%arg0: i32, %arg1: i32, %arg2: memref<304x1xf32, #tpu.memory_space<vmem>>, %arg3: memref<304x8xf32, #tpu.memory_space<vmem>>, %arg4: memref<1x8xf32, #tpu.memory_space<vmem>>) attributes {dimension_semantics = [#tpu.dimension_semantics<parallel>, #tpu.dimension_semantics<arbitrary>], iteration_bounds = array<i64: 1, 1>, scalar_prefetch = 0 : i64, scratch_operands = 0 : i64, tpu.core_type = #tpu.core_type<tc>, window_params = [{transform_indices = @transform_0, window_bounds = array<i64: 304, 1>}, {transform_indices = @transform_1, window_bounds = array<i64: 304, 8>}, {transform_indices = @transform_2, window_bounds = array<i64: 1, 8>}]} {
    %c0_i32 = arith.constant 0 : i32
    %0 = arith.cmpi eq, %arg1, %c0_i32 : i32
    %1 = arith.extui %0 : i1 to i32
    %c0_i32_0 = arith.constant 0 : i32
    %2 = arith.cmpi ne, %1, %c0_i32_0 : i32
    scf.if %2 {
      %cst_9 = arith.constant 0.000000e+00 : f32
      %25 = vector.broadcast %cst_9 : f32 to vector<1x8xf32>
      %c0_10 = arith.constant 0 : index
      %c0_11 = arith.constant 0 : index
      %26 = vector.load %arg4[%c0_10, %c0_11] : memref<1x8xf32, #tpu.memory_space<vmem>>, vector<1x8xf32>
      tpu.vector_store %arg4[%c0_10, %c0_11], %25 {strides = array<i32>} : memref<1x8xf32, #tpu.memory_space<vmem>>, vector<1x8xf32>,
    } else {
    }
    %c1_i32 = arith.constant 1 : i32
    %3 = arith.muli %arg0, %c1_i32 : i32
    %4 = arith.addi %3, %arg1 : i32
    %c304_i32 = arith.constant 304 : i32
    %5 = arith.muli %4, %c304_i32 : i32
    %6 = tpu.iota {dimensions = array<i32: 0>} : vector<304x1xi32>
    %7 = vector.broadcast %5 : i32 to vector<304x1xi32>
    %8 = arith.addi %7, %6 : vector<304x1xi32>
    %c300_i32 = arith.constant 300 : i32
    %9 = vector.broadcast %c300_i32 : i32 to vector<304x1xi32>
    %10 = arith.cmpi slt, %8, %9 : vector<304x1xi32>
    %c0 = arith.constant 0 : index
    %c0_1 = arith.constant 0 : index
    %11 = vector.load %arg2[%c0, %c0_1] : memref<304x1xf32, #tpu.memory_space<vmem>>, vector<304x1xf32>
    %c0_2 = arith.constant 0 : index
    %c0_3 = arith.constant 0 : index
    %12 = vector.load %arg3[%c0_2, %c0_3] : memref<304x8xf32, #tpu.memory_space<vmem>>, vector<304x8xf32>
    %13 = vector.broadcast %11 : vector<304x1xf32> to vector<304x8xf32>
    %14 = arith.subf %13, %12 : vector<304x8xf32>
    %cst = arith.constant 0.000000e+00 : f32
    %15 = vector.shape_cast %10 : vector<304x1xi1> to vector<304x1xi1>
    %16 = vector.broadcast %15 : vector<304x1xi1> to vector<304x8xi1>
    %17 = vector.broadcast %cst : f32 to vector<304x8xf32>
    %18 = arith.select %16, %14, %17 : vector<304x8xi1>, vector<304x8xf32>
    %c0_4 = arith.constant 0 : index
    %c0_5 = arith.constant 0 : index
    %19 = vector.load %arg4[%c0_4, %c0_5] : memref<1x8xf32, #tpu.memory_space<vmem>>, vector<1x8xf32>
    %20 = arith.mulf %18, %18 : vector<304x8xf32>
    %cst_6 = arith.constant dense<0.000000e+00> : vector<8xf32>
    %21 = vector.multi_reduction <add>, %20, %cst_6 [0] : vector<304x8xf32> to vector<8xf32>
    %22 = vector.shape_cast %21 : vector<8xf32> to vector<1x8xf32>
    %23 = arith.addf %19, %22 : vector<1x8xf32>
    %c0_7 = arith.constant 0 : index
    %c0_8 = arith.constant 0 : index
    %24 = vector.load %arg4[%c0_7, %c0_8] : memref<1x8xf32, #tpu.memory_space<vmem>>, vector<1x8xf32>
    tpu.vector_store %arg4[%c0_7, %c0_8], %23 {strides = array<i32>} : memref<1x8xf32, #tpu.memory_space<vmem>>, vector<1x8xf32>,
    return
  }
  func.func @transform_0(%arg0: i32, %arg1: i32) -> (i32, i32) {
    %c1_i32 = arith.constant 1 : i32
    %0 = arith.muli %arg0, %c1_i32 : i32
    %1 = arith.addi %0, %arg1 : i32
    %c0_i32 = arith.constant 0 : i32
    %2 = arith.minsi %1, %c0_i32 : i32
    %c0_i32_0 = arith.constant 0 : i32
    %c0_i32_1 = arith.constant 0 : i32
    return %2, %c0_i32_0 : i32, i32
  }
  func.func @transform_1(%arg0: i32, %arg1: i32) -> (i32, i32) {
    %c1_i32 = arith.constant 1 : i32
    %0 = arith.muli %arg0, %c1_i32 : i32
    %1 = arith.addi %0, %arg1 : i32
    %c0_i32 = arith.constant 0 : i32
    %2 = arith.minsi %1, %c0_i32 : i32
    %c0_i32_0 = arith.constant 0 : i32
    %c0_i32_1 = arith.constant 0 : i32
    return %2, %c0_i32_0 : i32, i32
  }
  func.func @transform_2(%arg0: i32, %arg1: i32) -> (i32, i32) {
    %c0_i32 = arith.constant 0 : i32
    %c0_i32_0 = arith.constant 0 : i32
    return %arg0, %c0_i32 : i32, i32
  }
}

</mosaic_0001>

<bundles_post_ra>
// kernel: tpu_custom_call.1
= control target key start
LH: loop header
LB: loop body
LE: loop exit
PB: predicated region body
PF: predicated region fallthrough
CT: control target
= control target key end

     0   :  { %v797_v2 = vmov 0   ;;  %s1095_s0 = inlined_call_operand.vmem [shape: f32[300,1], index: 0, kind: input, shape index: {}]   ;;  %s1096_s1 = inlined_call_operand.vmem [shape: f32[300,8], index: 1, kind: input, shape index: {}]   ;;  %s1097_s2 = inlined_call_operand.hbm [shape: f32[1,8], index: 2, kind: output, shape index: {}]  }
   0x1   :  { %v202_v0 = vld [vmem:[%s1095_s0 + $0x10] sm:$0xff]  ;;  %v200_v1 = vld [vmem:[%s1095_s0] sm:$0xff]  ;;  %772 = vset.pattern.permute.xlu1 %v797_v2  ;;  %771 = vset.pattern.permute.xlu0 %v797_v2  ;;  %v203_v3 = vld [vmem:[%s1095_s0 + $0x18] sm:$0xff] }
   0x2   :  { %288 = vperm.xlu1 %772, %v202_v0   ;;  %278 = vperm.xlu0 %771, %v200_v1   ;;  %v201_v4 = vld [vmem:[%s1095_s0 + $0x8] sm:$0xff]  ;;  %v204_v6 = vld [vmem:[%s1095_s0 + $0x20] sm:$0xff]  ;;  %v207_v7 = vld [vmem:[%s1095_s0 + $0x38] sm:$0xff] }
   0x3   :  { %v205_v5 = vld [vmem:[%s1095_s0 + $0x28] sm:$0xff]  ;;  %v206_v8 = vld [vmem:[%s1095_s0 + $0x30] sm:$0xff]  ;;  %v208_v10 = vld [vmem:[%s1095_s0 + $0x40] sm:$0xff] }
   0x4   :  { %v209_v9 = vld [vmem:[%s1095_s0 + $0x48] sm:$0xff] }
   0x6   :  { %293 = vperm.xlu1 %772, %v203_v3   ;;  %283 = vperm.xlu0 %771, %v201_v4  }
   0xa   :  { %303 = vperm.xlu1 %772, %v205_v5   ;;  %298 = vperm.xlu0 %771, %v204_v6  }
   0xe   :  { %313 = vperm.xlu1 %772, %v207_v7   ;;  %308 = vperm.xlu0 %771, %v206_v8  }
   0xf   :  { %7 = vsyncpa [#allocation3], 0  ;;  %v211_v11 = vld [vmem:[%s1095_s0 + $0x58] sm:$0xff]  ;;  %v210_v12 = vld [vmem:[%s1095_s0 + $0x50] sm:$0xff]  ;;  %vm80_vm0 = vcmask 57344   ;;  %v798_v39 = vmov 0.0  }
  0x10   :  { %v213_v13 = vld [vmem:[%s1095_s0 + $0x68] sm:$0xff]  ;;  %v212_v14 = vld [vmem:[%s1095_s0 + $0x60] sm:$0xff]  ;;  %v215_v15 = vld [vmem:[%s1095_s0 + $0x78] sm:$0xff]  ;;  %81 = vst.msk [vmem:[#allocation2] sm:$0x1] %vm80_vm0, %v798_v39  ;;  %vm657_vm1 = vcmask 64512  }
  0x11   :  { %v214_v16 = vld [vmem:[%s1095_s0 + $0x70] sm:$0xff]  ;;  %v217_v17 = vld [vmem:[%s1095_s0 + $0x88] sm:$0xff]  ;;  %v216_v18 = vld [vmem:[%s1095_s0 + $0x80] sm:$0xff] }
  0x12   :  { %323 = vperm.xlu1 %772, %v209_v9   ;;  %318 = vperm.xlu0 %771, %v208_v10   ;;  %v219_v19 = vld [vmem:[%s1095_s0 + $0x98] sm:$0xff]  ;;  %v218_v20 = vld [vmem:[%s1095_s0 + $0x90] sm:$0xff]  ;;  %v221_v21 = vld [vmem:[%s1095_s0 + $0xa8] sm:$0xff] }
  0x13   :  { %v220_v22 = vld [vmem:[%s1095_s0 + $0xa0] sm:$0xff]  ;;  %v223_v23 = vld [vmem:[%s1095_s0 + $0xb8] sm:$0xff]  ;;  %v222_v24 = vld [vmem:[%s1095_s0 + $0xb0] sm:$0xff] }
  0x14   :  { %v225_v25 = vld [vmem:[%s1095_s0 + $0xc8] sm:$0xff]  ;;  %v224_v26 = vld [vmem:[%s1095_s0 + $0xc0] sm:$0xff]  ;;  %v227_v27 = vld [vmem:[%s1095_s0 + $0xd8] sm:$0xff] }
  0x15   :  { %v226_v28 = vld [vmem:[%s1095_s0 + $0xd0] sm:$0xff]  ;;  %v229_v29 = vld [vmem:[%s1095_s0 + $0xe8] sm:$0xff]  ;;  %v228_v30 = vld [vmem:[%s1095_s0 + $0xe0] sm:$0xff] }
  0x16   :  { %333 = vperm.xlu1 %772, %v211_v11   ;;  %328 = vperm.xlu0 %771, %v210_v12   ;;  %v231_v31 = vld [vmem:[%s1095_s0 + $0xf8] sm:$0xff]  ;;  %v230_v32 = vld [vmem:[%s1095_s0 + $0xf0] sm:$0xff]  ;;  %v233_v33 = vld [vmem:[%s1095_s0 + $0x108] sm:$0xff] }
  0x17   :  { %v232_v34 = vld [vmem:[%s1095_s0 + $0x100] sm:$0xff]  ;;  %v235_v35 = vld [vmem:[%s1095_s0 + $0x118] sm:$0xff]  ;;  %v234_v36 = vld [vmem:[%s1095_s0 + $0x110] sm:$0xff] }
  0x18   :  { %v237_v37 = vld [vmem:[%s1095_s0 + $0x128] sm:$0xff]  ;;  %v236_v38 = vld [vmem:[%s1095_s0 + $0x120] sm:$0xff]  ;;  %v240_v41 = vld [vmem:[%s1096_s1 + $0x10] sm:$0xff] }
  0x19   :  { %v238_v40 = vld [vmem:[%s1096_s1] sm:$0xff]  ;;  %v241_v45 = vld [vmem:[%s1096_s1 + $0x18] sm:$0xff]  ;;  %v239_v46 = vld [vmem:[%s1096_s1 + $0x8] sm:$0xff] }
  0x1a   :  { %343 = vperm.xlu1 %772, %v213_v13   ;;  %338 = vperm.xlu0 %771, %v212_v14   ;;  %v243_v53 = vld [vmem:[%s1096_s1 + $0x28] sm:$0xff]  ;;  %v242_v54 = vld [vmem:[%s1096_s1 + $0x20] sm:$0xff]  ;;  %v245_v1 = vld [vmem:[%s1096_s1 + $0x38] sm:$0xff] }
  0x1b   :  { %v244_v2 = vld [vmem:[%s1096_s1 + $0x30] sm:$0xff]  ;;  %v247_v13 = vld [vmem:[%s1096_s1 + $0x48] sm:$0xff]  ;;  %v246_v14 = vld [vmem:[%s1096_s1 + $0x40] sm:$0xff] }
  0x1e   :  { %353 = vperm.xlu1 %772, %v215_v15   ;;  %348 = vperm.xlu0 %771, %v214_v16  }
  0x22   :  { %363 = vperm.xlu1 %772, %v217_v17   ;;  %358 = vperm.xlu0 %771, %v216_v18  }
  0x26   :  { %373 = vperm.xlu1 %772, %v219_v19   ;;  %368 = vperm.xlu0 %771, %v218_v20  }
  0x2a   :  { %383 = vperm.xlu1 %772, %v221_v21   ;;  %378 = vperm.xlu0 %771, %v220_v22  }
  0x2e   :  { %393 = vperm.xlu1 %772, %v223_v23   ;;  %388 = vperm.xlu0 %771, %v222_v24  }
  0x32   :  { %403 = vperm.xlu1 %772, %v225_v25   ;;  %398 = vperm.xlu0 %771, %v224_v26   ;;  %v249_v25 = vld [vmem:[%s1096_s1 + $0x58] sm:$0xff]  ;;  %v248_v26 = vld [vmem:[%s1096_s1 + $0x50] sm:$0xff] }
  0x36   :  { %413 = vperm.xlu1 %772, %v227_v27   ;;  %408 = vperm.xlu0 %771, %v226_v28  }
  0x3a   :  { %423 = vperm.xlu1 %772, %v229_v29   ;;  %418 = vperm.xlu0 %771, %v228_v30  }
  0x3e   :  { %433 = vperm.xlu1 %772, %v231_v31   ;;  %428 = vperm.xlu0 %771, %v230_v32  }
  0x42   :  { %443 = vperm.xlu1 %772, %v233_v33   ;;  %438 = vperm.xlu0 %771, %v232_v34  }
  0x46   :  { %453 = vperm.xlu1 %772, %v235_v35   ;;  %448 = vperm.xlu0 %771, %v234_v36  }
  0x4a   :  { %463 = vperm.xlu1 %772, %v237_v37   ;;  %458 = vperm.xlu0 %771, %v236_v38   ;;  %v251_v37 = vld [vmem:[%s1096_s1 + $0x68] sm:$0xff]  ;;  %v250_v38 = vld [vmem:[%s1096_s1 + $0x60] sm:$0xff] }
  0x81   :  { %v289_v42 = vpop.permute.xlu1 %288  ;;  %v279_v43 = vpop.permute.xlu0 %278 }
  0x82   :  { %v466_v44 = vsub.f32 %v279_v43, %v238_v40  ;;  %v468_v47 = vsub.f32 %v289_v42, %v240_v41 }
  0x84   :  { %v619_v48 = vmul.f32 %v466_v44, %v466_v44  ;;  %v621_v55 = vmul.f32 %v468_v47, %v468_v47 }
  0x85   :  { %v294_v49 = vpop.permute.xlu1 %293  ;;  %v284_v50 = vpop.permute.xlu0 %283 }
  0x86   :  { %v469_v51 = vsub.f32 %v294_v49, %v241_v45  ;;  %v467_v52 = vsub.f32 %v284_v50, %v239_v46  ;;  %v658_v57 = vsel %vm657_vm1, %v619_v48, 0.0  ;;  %v661_v3 = vsel %vm657_vm1, %v621_v55, 0.0  ;;  %v253_v49 = vld [vmem:[%s1096_s1 + $0x78] sm:$0xff]  ;;  %v252_v50 = vld [vmem:[%s1096_s1 + $0x70] sm:$0xff] }
  0x88   :  { %v620_v56 = vmul.f32 %v467_v52, %v467_v52  ;;  %v622_v60 = vmul.f32 %v469_v51, %v469_v51 }
  0x89   :  { %v304_v58 = vpop.permute.xlu1 %303  ;;  %v299_v59 = vpop.permute.xlu0 %298 }
  0x8a   :  { %v659_v61 = vsel %vm657_vm1, %v620_v56, 0.0  ;;  %v471_v62 = vsub.f32 %v304_v58, %v243_v53  ;;  %v470_v63 = vsub.f32 %v299_v59, %v242_v54  ;;  %v663_v8 = vsel %vm657_vm1, %v622_v60, 0.0 }
  0x8b   :  { %v660_v0 = vadd.f32 %v659_v61, %v658_v57  ;;  %v255_v61 = vld [vmem:[%s1096_s1 + $0x88] sm:$0xff] }
  0x8c   :  { %v623_v4 = vmul.f32 %v470_v63, %v470_v63  ;;  %v624_v9 = vmul.f32 %v471_v62, %v471_v62  ;;  %v254_v62 = vld [vmem:[%s1096_s1 + $0x80] sm:$0xff] }
  0x8d   :  { %v662_v5 = vadd.f32 %v661_v3, %v660_v0  ;;  %v314_v6 = vpop.permute.xlu1 %313  ;;  %v309_v7 = vpop.permute.xlu0 %308 }
  0x8e   :  { %v473_v10 = vsub.f32 %v314_v6, %v245_v1  ;;  %v472_v11 = vsub.f32 %v309_v7, %v244_v2  ;;  %v665_v15 = vsel %vm657_vm1, %v623_v4, 0.0  ;;  %v667_v20 = vsel %vm657_vm1, %v624_v9, 0.0  ;;  %v257_v9 = vld [vmem:[%s1096_s1 + $0x98] sm:$0xff] }
  0x8f   :  { %v664_v12 = vadd.f32 %v663_v8, %v662_v5 }
  0x90   :  { %v625_v16 = vmul.f32 %v472_v11, %v472_v11  ;;  %v626_v21 = vmul.f32 %v473_v10, %v473_v10  ;;  %v256_v10 = vld [vmem:[%s1096_s1 + $0x90] sm:$0xff] }
  0x91   :  { %v666_v17 = vadd.f32 %v665_v15, %v664_v12  ;;  %v324_v18 = vpop.permute.xlu1 %323  ;;  %v319_v19 = vpop.permute.xlu0 %318 }
  0x92   :  { %v475_v22 = vsub.f32 %v324_v18, %v247_v13  ;;  %v474_v23 = vsub.f32 %v319_v19, %v246_v14  ;;  %v669_v27 = vsel %vm657_vm1, %v625_v16, 0.0  ;;  %v671_v32 = vsel %vm657_vm1, %v626_v21, 0.0  ;;  %v259_v21 = vld [vmem:[%s1096_s1 + $0xa8] sm:$0xff] }
  0x93   :  { %v668_v24 = vadd.f32 %v667_v20, %v666_v17 }
  0x94   :  { %v627_v28 = vmul.f32 %v474_v23, %v474_v23  ;;  %v628_v33 = vmul.f32 %v475_v22, %v475_v22  ;;  %v258_v22 = vld [vmem:[%s1096_s1 + $0xa0] sm:$0xff] }
  0x95   :  { %v670_v29 = vadd.f32 %v669_v27, %v668_v24  ;;  %v334_v30 = vpop.permute.xlu1 %333  ;;  %v329_v31 = vpop.permute.xlu0 %328 }
  0x96   :  { %v477_v34 = vsub.f32 %v334_v30, %v249_v25  ;;  %v476_v35 = vsub.f32 %v329_v31, %v248_v26  ;;  %v673_v39 = vsel %vm657_vm1, %v627_v28, 0.0  ;;  %v675_v44 = vsel %vm657_vm1, %v628_v33, 0.0  ;;  %v261_v33 = vld [vmem:[%s1096_s1 + $0xb8] sm:$0xff] }
  0x97   :  { %v672_v36 = vadd.f32 %v671_v32, %v670_v29 }
  0x98   :  { %v629_v40 = vmul.f32 %v476_v35, %v476_v35  ;;  %v630_v45 = vmul.f32 %v477_v34, %v477_v34  ;;  %v260_v34 = vld [vmem:[%s1096_s1 + $0xb0] sm:$0xff] }
  0x99   :  { %v674_v41 = vadd.f32 %v673_v39, %v672_v36  ;;  %v344_v42 = vpop.permute.xlu1 %343  ;;  %v339_v43 = vpop.permute.xlu0 %338 }
  0x9a   :  { %v479_v46 = vsub.f32 %v344_v42, %v251_v37  ;;  %v478_v47 = vsub.f32 %v339_v43, %v250_v38  ;;  %v677_v51 = vsel %vm657_vm1, %v629_v40, 0.0  ;;  %v679_v56 = vsel %vm657_vm1, %v630_v45, 0.0  ;;  %v263_v45 = vld [vmem:[%s1096_s1 + $0xc8] sm:$0xff] }
  0x9b   :  { %v676_v48 = vadd.f32 %v675_v44, %v674_v41 }
  0x9c   :  { %v631_v52 = vmul.f32 %v478_v47, %v478_v47  ;;  %v632_v57 = vmul.f32 %v479_v46, %v479_v46  ;;  %v262_v46 = vld [vmem:[%s1096_s1 + $0xc0] sm:$0xff] }
  0x9d   :  { %v678_v53 = vadd.f32 %v677_v51, %v676_v48  ;;  %v354_v54 = vpop.permute.xlu1 %353  ;;  %v349_v55 = vpop.permute.xlu0 %348 }
  0x9e   :  { %v481_v58 = vsub.f32 %v354_v54, %v253_v49  ;;  %v480_v59 = vsub.f32 %v349_v55, %v252_v50  ;;  %v681_v63 = vsel %vm657_vm1, %v631_v52, 0.0  ;;  %v683_v4 = vsel %vm657_vm1, %v632_v57, 0.0  ;;  %v265_v57 = vld [vmem:[%s1096_s1 + $0xd8] sm:$0xff] }
  0x9f   :  { %v680_v60 = vadd.f32 %v679_v56, %v678_v53 }
  0xa0   :  { %v633_v0 = vmul.f32 %v480_v59, %v480_v59  ;;  %v634_v5 = vmul.f32 %v481_v58, %v481_v58  ;;  %v264_v58 = vld [vmem:[%s1096_s1 + $0xd0] sm:$0xff] }
  0xa1   :  { %v682_v1 = vadd.f32 %v681_v63, %v680_v60  ;;  %v364_v2 = vpop.permute.xlu1 %363  ;;  %v359_v3 = vpop.permute.xlu0 %358 }
  0xa2   :  { %v483_v6 = vsub.f32 %v364_v2, %v255_v61  ;;  %v482_v7 = vsub.f32 %v359_v3, %v254_v62  ;;  %v685_v11 = vsel %vm657_vm1, %v633_v0, 0.0  ;;  %v687_v16 = vsel %vm657_vm1, %v634_v5, 0.0  ;;  %v267_v5 = vld [vmem:[%s1096_s1 + $0xe8] sm:$0xff] }
  0xa3   :  { %v684_v8 = vadd.f32 %v683_v4, %v682_v1 }
  0xa4   :  { %v635_v12 = vmul.f32 %v482_v7, %v482_v7  ;;  %v636_v17 = vmul.f32 %v483_v6, %v483_v6  ;;  %v266_v6 = vld [vmem:[%s1096_s1 + $0xe0] sm:$0xff] }
  0xa5   :  { %v686_v13 = vadd.f32 %v685_v11, %v684_v8  ;;  %v374_v14 = vpop.permute.xlu1 %373  ;;  %v369_v15 = vpop.permute.xlu0 %368 }
  0xa6   :  { %v485_v18 = vsub.f32 %v374_v14, %v257_v9  ;;  %v484_v19 = vsub.f32 %v369_v15, %v256_v10  ;;  %v689_v23 = vsel %vm657_vm1, %v635_v12, 0.0  ;;  %v691_v28 = vsel %vm657_vm1, %v636_v17, 0.0  ;;  %v269_v17 = vld [vmem:[%s1096_s1 + $0xf8] sm:$0xff] }
  0xa7   :  { %v688_v20 = vadd.f32 %v687_v16, %v686_v13 }
  0xa8   :  { %v637_v24 = vmul.f32 %v484_v19, %v484_v19  ;;  %v638_v29 = vmul.f32 %v485_v18, %v485_v18  ;;  %v268_v18 = vld [vmem:[%s1096_s1 + $0xf0] sm:$0xff] }
  0xa9   :  { %v690_v25 = vadd.f32 %v689_v23, %v688_v20  ;;  %v384_v26 = vpop.permute.xlu1 %383  ;;  %v379_v27 = vpop.permute.xlu0 %378 }
  0xaa   :  { %v487_v30 = vsub.f32 %v384_v26, %v259_v21  ;;  %v486_v31 = vsub.f32 %v379_v27, %v258_v22  ;;  %v693_v35 = vsel %vm657_vm1, %v637_v24, 0.0  ;;  %v695_v40 = vsel %vm657_vm1, %v638_v29, 0.0 }
  0xab   :  { %v692_v32 = vadd.f32 %v691_v28, %v690_v25  ;;  %v84_v24 = vlaneseq }
  0xac   :  { %v639_v36 = vmul.f32 %v486_v31, %v486_v31  ;;  %v640_v41 = vmul.f32 %v487_v30, %v487_v30  ;;  %v271_v30 = vld [vmem:[%s1096_s1 + $0x108] sm:$0xff]  ;;  %v270_v31 = vld [vmem:[%s1096_s1 + $0x100] sm:$0xff] }
  0xad   :  { %v694_v37 = vadd.f32 %v693_v35, %v692_v32  ;;  %v394_v38 = vpop.permute.xlu1 %393  ;;  %v389_v39 = vpop.permute.xlu0 %388 }
  0xae   :  { %v489_v42 = vsub.f32 %v394_v38, %v261_v33  ;;  %v488_v43 = vsub.f32 %v389_v39, %v260_v34  ;;  %v697_v47 = vsel %vm657_vm1, %v639_v36, 0.0  ;;  %v699_v52 = vsel %vm657_vm1, %v640_v41, 0.0 }
  0xaf   :  { %v696_v44 = vadd.f32 %v695_v40, %v694_v37  ;;  %v85_v37 = vshrl.u32 %v84_v24, 7 }
  0xb0   :  { %v641_v48 = vmul.f32 %v488_v43, %v488_v43  ;;  %v642_v53 = vmul.f32 %v489_v42, %v489_v42  ;;  %v273_v43 = vld [vmem:[%s1096_s1 + $0x118] sm:$0xff] }
  0xb1   :  { %v698_v49 = vadd.f32 %v697_v47, %v696_v44  ;;  %v404_v50 = vpop.permute.xlu1 %403  ;;  %v399_v51 = vpop.permute.xlu0 %398  ;;  %v272_v44 = vld [vmem:[%s1096_s1 + $0x110] sm:$0xff] }
  0xb2   :  { %v491_v54 = vsub.f32 %v404_v50, %v263_v45  ;;  %v490_v55 = vsub.f32 %v399_v51, %v262_v46  ;;  %v701_v59 = vsel %vm657_vm1, %v641_v48, 0.0  ;;  %v703_v0 = vsel %vm657_vm1, %v642_v53, 0.0 }
  0xb3   :  { %v700_v56 = vadd.f32 %v699_v52, %v698_v49  ;;  %v122_v50 = vadd.s32 296, %v85_v37 }
  0xb4   :  { %v643_v60 = vmul.f32 %v490_v55, %v490_v55  ;;  %v644_v1 = vmul.f32 %v491_v54, %v491_v54 }
  0xb5   :  { %v702_v61 = vadd.f32 %v701_v59, %v700_v56  ;;  %v414_v62 = vpop.permute.xlu1 %413  ;;  %v409_v63 = vpop.permute.xlu0 %408  ;;  %v275_v56 = vld [vmem:[%s1096_s1 + $0x128] sm:$0xff]  ;;  %vm199_vm2 = vcmp.lt.s32.totalorder %v122_v50, 300 }
  0xb6   :  { %v493_v2 = vsub.f32 %v414_v62, %v265_v57  ;;  %v492_v3 = vsub.f32 %v409_v63, %v264_v58  ;;  %v705_v7 = vsel %vm657_vm1, %v643_v60, 0.0  ;;  %v707_v12 = vsel %vm657_vm1, %v644_v1, 0.0  ;;  %v274_v57 = vld [vmem:[%s1096_s1 + $0x120] sm:$0xff]  ;;  %s799_s1 = smov [#allocation2]  }
  0xb7   :  { %v704_v4 = vadd.f32 %v703_v0, %v702_v61  ;;  %s748_s18 = sshll.u32 %s799_s1, 4  ;;  %s749_s18 = int_to_ptr.vmem [resolvable:$true] %s748_s18 }
  0xb8   :  { %v645_v8 = vmul.f32 %v492_v3, %v492_v3  ;;  %v646_v13 = vmul.f32 %v493_v2, %v493_v2  ;;  %s773_s19 = scalar_lea.vmem %s749_s18, 16  ;;  %s777_s20 = scalar_lea.vmem %s749_s18, 32 }
  0xb9   :  { %v706_v9 = vadd.f32 %v705_v7, %v704_v4  ;;  %v424_v10 = vpop.permute.xlu1 %423  ;;  %v419_v11 = vpop.permute.xlu0 %418  ;;  %p774_p0 = scmp.ne.s32.totalorder %s749_s18, %s773_s19  ;;  %p778_p1 = scmp.lt.s32.totalorder %s749_s18, %s749_s18 }
  0xba   :  { %v495_v14 = vsub.f32 %v424_v10, %v267_v5  ;;  %v494_v15 = vsub.f32 %v419_v11, %v266_v6  ;;  %v709_v19 = vsel %vm657_vm1, %v645_v8, 0.0  ;;  %v711_v25 = vsel %vm657_vm1, %v646_v13, 0.0  ;;  %p779_p2 = scmp.lt.s32.totalorder %s777_s20, %s773_s19 }
  0xbb   :  { %v708_v16 = vadd.f32 %v707_v12, %v706_v9 }
  0xbc   :  { %v647_v20 = vmul.f32 %v494_v15, %v494_v15  ;;  %v648_v26 = vmul.f32 %v495_v14, %v495_v14  ;;  %p780_p3 = por %p779_p2, %p778_p1 }
  0xbd   :  { %v710_v21 = vadd.f32 %v709_v19, %v708_v16  ;;  %v434_v22 = vpop.permute.xlu1 %433  ;;  %v429_v23 = vpop.permute.xlu0 %428 }
  0xbe   :  { %v497_v27 = vsub.f32 %v434_v22, %v269_v17  ;;  %v496_v28 = vsub.f32 %v429_v23, %v268_v18  ;;  %v713_v32 = vsel %vm657_vm1, %v647_v20, 0.0  ;;  %v715_v38 = vsel %vm657_vm1, %v648_v26, 0.0  ;;  %v618_v20 = vld [vmem:[#allocation2] sm:$0x1]  ;;  %p781_p4 = pnand %p780_p3, %p774_p0 }
  0xbf   :  { %v712_v29 = vadd.f32 %v711_v25, %v710_v21 }
  0xc0   :  { %v649_v33 = vmul.f32 %v496_v28, %v496_v28  ;;  %v650_v39 = vmul.f32 %v497_v27, %v497_v27 }
  0xc1   :  { %v714_v34 = vadd.f32 %v713_v32, %v712_v29  ;;  %v444_v35 = vpop.permute.xlu1 %443  ;;  %v439_v36 = vpop.permute.xlu0 %438 }
  0xc2   :  { %v499_v40 = vsub.f32 %v444_v35, %v271_v30  ;;  %v498_v41 = vsub.f32 %v439_v36, %v270_v31  ;;  %v717_v45 = vsel %vm657_vm1, %v649_v33, 0.0  ;;  %v719_v51 = vsel %vm657_vm1, %v650_v39, 0.0 }
  0xc3   :  { %v716_v42 = vadd.f32 %v715_v38, %v714_v34 }
  0xc4   :  { %v651_v46 = vmul.f32 %v498_v41, %v498_v41  ;;  %v652_v52 = vmul.f32 %v499_v40, %v499_v40 }
  0xc5   :  { %v718_v47 = vadd.f32 %v717_v45, %v716_v42  ;;  %v454_v48 = vpop.permute.xlu1 %453  ;;  %v449_v49 = vpop.permute.xlu0 %448 }
  0xc6   :  { %v501_v53 = vsub.f32 %v454_v48, %v273_v43  ;;  %v500_v54 = vsub.f32 %v449_v49, %v272_v44  ;;  %v721_v58 = vsel %vm657_vm1, %v651_v46, 0.0  ;;  %v723_v63 = vsel %vm657_vm1, %v652_v52, 0.0 }
  0xc7   :  { %v720_v55 = vadd.f32 %v719_v51, %v718_v47 }
  0xc8   :  { %v653_v59 = vmul.f32 %v500_v54, %v500_v54  ;;  %v654_v0 = vmul.f32 %v501_v53, %v501_v53 }
  0xc9   :  { %v722_v60 = vadd.f32 %v721_v58, %v720_v55  ;;  %v464_v61 = vpop.permute.xlu1 %463  ;;  %v459_v62 = vpop.permute.xlu0 %458 }
  0xca   :  { %v503_v1 = vsub.f32 %v464_v61, %v275_v56  ;;  %v502_v2 = vsub.f32 %v459_v62, %v274_v57  ;;  %v725_v4 = vsel %vm657_vm1, %v653_v59, 0.0  ;;  %v727_v8 = vsel %vm657_vm1, %v654_v0, 0.0 }
  0xcb   :  { %v724_v3 = vadd.f32 %v723_v63, %v722_v60 }
  0xcc   :  { %v617_v5 = vsel %vm199_vm2, %v503_v1, 0.0  ;;  %v655_v6 = vmul.f32 %v502_v2, %v502_v2 }
  0xcd   :  { %v726_v7 = vadd.f32 %v725_v4, %v724_v3  ;;  %v656_v9 = vmul.f32 %v617_v5, %v617_v5 }
  0xce   :  { %v729_v11 = vsel %vm657_vm1, %v655_v6, 0.0 }
  0xcf   :  { %v728_v10 = vadd.f32 %v727_v8, %v726_v7  ;;  %v731_v13 = vsel %vm657_vm1, %v656_v9, 0.0 }
  0xd1   :  { %v730_v12 = vadd.f32 %v729_v11, %v728_v10 }
  0xd3   :  { %v732_v14 = vadd.f32 %v731_v13, %v730_v12 }
  0xd5   :  { %v733_v15 = vrot.slane %v732_v14, 4 }
  0xd7   :  { %v734_v16 = vadd.f32 %v733_v15, %v732_v14 }
  0xd9   :  { %v735_v17 = vrot.slane %v734_v16, 2 }
  0xdb   :  { %v736_v18 = vadd.f32 %v735_v17, %v734_v16 }
  0xdd   :  { %v737_v19 = vrot.slane %v736_v18, 1 }
  0xdf   :  { %v738_v21 = vadd.f32 %v737_v19, %v736_v18 }
  0xe1   :  { %v739_v22 = vadd.f32 %v738_v21, %v618_v20 }
  0xe3   :  { %741 = vst.msk [vmem:[#allocation2] sm:$0x1] %vm80_vm0, %v739_v22 }
  0xe4   :  { %784 = shalt.err (!%p781_p4)
}
  0xe5   :  { %s785_s23 = scalar_lea.hbm %s1097_s2, 16 }
  0xe6   :  { %p786_p5 = scmp.ne.s32.totalorder %s1097_s2, %s785_s23  ;;  %p789_p6 = scmp.lt.u32.totalorder %s785_s23, %s1097_s2 }
  0xe8   :  { %p791_p7 = pnand %p789_p6, %p786_p5 }
  0xea   :  { %794 = shalt.err (!%p791_p7)
}
  0xeb   :  { %751 = dma.vmem_to_hbm [thread:$0]  %s749_s18, 16, %s1097_s2, [#allocation3]  }
  0xec   :  { %795 = dma.done.wait [#allocation3], 16  }
  0xed   :  { %796 = vsyncadd [#allocation3], 4294967280 }
  0xee   :  { %755 = vsyncpa [#allocation3], 1 }

</bundles_post_ra>
